<compile_context>
chip_gen: v5e
topology: v5e:2x2
jax: 0.10.0
libtpu: 0.0.40
codegen_flags: <defaults>
</compile_context>

<pallas_src>
import jax
import jax.numpy as jnp
from jax import lax
from jax.experimental import pallas as pl
from jax.experimental.pallas import tpu as pltpu


def _round_up(x, m):
    return ((x + m - 1) // m) * m


# ---------------------------------------------------------------------------
# Fast path: embedding table resident in VMEM, gather via one-hot MXU matmuls.
# ---------------------------------------------------------------------------
def _fast_vmem_kernel(tok_ref, bag_ref, invcnt_ref, emb_ref, w_ref, b_ref,
                      out_ref, acc_ref):
    t = pl.program_id(0)
    n_tiles = pl.num_programs(0)
    V_pad = emb_ref.shape[0]
    B_pad, _D = acc_ref.shape
    TK = bag_ref.shape[-1]

    @pl.when(t == 0)
    def _():
        acc_ref[...] = jnp.zeros_like(acc_ref)

    toks = tok_ref[0]                                        # (TK, 1) int32
    bids = bag_ref[0]                                        # (1, TK) int32
    emb = emb_ref[...]                                       # (V_pad, D)

    # onehot[k, v] = (tok[k] == v); assign[b, k] = (bag[k] == b).
    # Padding tokens carry bag id == B_pad -> all-zero assign column -> no effect.
    vocab_ids = lax.broadcasted_iota(jnp.int32, (TK, V_pad), 1)
    onehot_kv = (vocab_ids == toks).astype(emb.dtype)        # (TK, V_pad)
    bag_rows = lax.broadcasted_iota(jnp.int32, (B_pad, TK), 0)
    assign = (bag_rows == bids).astype(emb.dtype)            # (B_pad, TK)

    # scat[b, v] = #tokens with vocab id v in bag b within this tile (exact ints).
    scat = jnp.dot(assign, onehot_kv, preferred_element_type=jnp.float32)
    acc_ref[...] += jnp.dot(scat.astype(emb.dtype), emb,
                            preferred_element_type=jnp.float32)

    @pl.when(t == n_tiles - 1)
    def _():
        pooled = acc_ref[...] * invcnt_ref[...]              # mean = sum * (1/count)
        logits = jnp.dot(pooled, w_ref[...],
                         preferred_element_type=jnp.float32) + b_ref[...]
        out_ref[...] = logits.astype(out_ref.dtype)


# ---------------------------------------------------------------------------
# HBM path: large vocab, manual double-buffered row-gather DMAs.
# ---------------------------------------------------------------------------
def _hbm_gather_kernel(text_ref,                              # SMEM (L_pad,) int32 (scalar prefetch)
                       bag_ref, invcnt_ref, emb_hbm, w_ref, b_ref,
                       out_ref,
                       rows_buf, sems, acc_ref):
    TK = rows_buf.shape[1]
    B_pad, _D = acc_ref.shape

    t = pl.program_id(0)
    n_tiles = pl.num_programs(0)
    slot = t % 2

    def issue_gather(tile, slot_):
        base = tile * TK

        def body(k, carry):
            tok = text_ref[base + k]                          # scalar read before any wait
            pltpu.make_async_copy(
                emb_hbm.at[pl.ds(tok, 1), :],
                rows_buf.at[slot_, pl.ds(k, 1), :],
                sems.at[slot_],
            ).start()
            return carry

        lax.fori_loop(0, TK, body, 0)

    # First step: zero the accumulator and prime slot 0.
    @pl.when(t == 0)
    def _():
        acc_ref[...] = jnp.zeros_like(acc_ref)
        issue_gather(0, 0)

    # Prefetch the next token tile into the other slot (overlaps wait + compute).
    @pl.when(t + 1 < n_tiles)
    def _():
        issue_gather(t + 1, 1 - slot)

    # Single wait covering the whole slot buffer: the TK row copies signalled this
    # slot's semaphore and their byte counts sum to exactly (TK, D).
    pltpu.make_async_copy(
        emb_hbm.at[pl.ds(0, TK), :],
        rows_buf.at[slot],
        sems.at[slot],
    ).wait()

    rows = rows_buf[slot]                                     # (TK, D), table dtype (no upcast)
    bids = bag_ref[0]                                         # (1, TK) int32
    bag_rows = lax.broadcasted_iota(jnp.int32, (B_pad, TK), 0)
    assign = (bag_rows == bids).astype(rows.dtype)            # (B_pad, TK)
    acc_ref[...] += jnp.dot(assign, rows, preferred_element_type=jnp.float32)

    @pl.when(t == n_tiles - 1)
    def _():
        pooled = acc_ref[...] * invcnt_ref[...]
        logits = jnp.dot(pooled, w_ref[...],
                         preferred_element_type=jnp.float32) + b_ref[...]
        out_ref[...] = logits.astype(out_ref.dtype)


# ---------------------------------------------------------------------------
# Wrapper
# ---------------------------------------------------------------------------
def text_classification_forward(text, offsets, emb_table, fc_w, fc_b, *,
                                tk=None, force_hbm_gather=False):
    """Equivalent of TextClassificationModel.forward(text, offsets)."""
    L = int(text.shape[0])
    B = int(offsets.shape[0])
    V, D = int(emb_table.shape[0]), int(emb_table.shape[1])
    C = int(fc_b.shape[0])

    emb_bytes = jnp.dtype(emb_table.dtype).itemsize
    V_pad = _round_up(V, 8)
    table_vmem_bytes = V_pad * _round_up(D, 128) * emb_bytes
    use_fast = (not force_hbm_gather) and (V_pad <= 4096) and (table_vmem_bytes <= (4 << 20))

    # Token tile: big enough to fill the MXU K dim and keep many gather DMAs in
    # flight (review: 128 v5e / 256 v6e+), clamped for tiny inputs.
    TK = 256 if tk is None else int(tk)
    TK = max(8, _round_up(min(TK, max(L, 1)), 8))
    if not use_fast:
        TK = min(TK, max(8, (V // 8) * 8))   # wait-descriptor source slice needs TK <= V
    num_tiles = max(1, -(-L // TK))
    L_pad = num_tiles * TK

    B_pad = max(8, _round_up(B, 8))
    C_pad = _round_up(C, 128)                # lane-dense fc / output tiles

    text = text.astype(jnp.int32)
    offsets = offsets.astype(jnp.int32)

    # Per-bag 1/count (empty bag -> contributes zeros, like torch mean-mode).
    offsets_ext = jnp.concatenate([offsets, jnp.array([L], jnp.int32)])
    counts = offsets_ext[1:] - offsets_ext[:-1]
    inv_count = jnp.where(counts > 0,
                          1.0 / jnp.maximum(counts, 1).astype(jnp.float32), 0.0)
    inv_count = jnp.pad(inv_count, (0, B_pad - B)).reshape(B_pad, 1)

    # Per-token bag id; padding tokens get sentinel B_pad (matches no bag row).
    bag_id = (jnp.searchsorted(offsets, jnp.arange(L, dtype=jnp.int32),
                               side="right") - 1).astype(jnp.int32)
    pad = L_pad - L
    text_p = jnp.clip(jnp.pad(text, (0, pad)), 0, V - 1)      # OOB-safe indices
    bag_id_p = jnp.pad(bag_id, (0, pad), constant_values=B_pad)
    bag_3d = bag_id_p.reshape(num_tiles, 1, TK)
    tok_col_3d = text_p.reshape(num_tiles, TK, 1)

    w_t = jnp.pad(fc_w.T.astype(jnp.float32), ((0, 0), (0, C_pad - C)))   # (D, C_pad)
    bias2d = jnp.pad(fc_b.astype(jnp.float32), (0, C_pad - C)).reshape(1, C_pad)

    # Explicit VMEM budget (coarse), capped at 32 MiB -> safe on v5e/v6e/v7x.
    lane = lambda n: _round_up(n, 128)
    sub = lambda n: _round_up(n, 8)
    est = (B_pad * lane(D) * 4                      # accumulator
           + 2 * B_pad * lane(C_pad) * 4            # output
           + 2 * sub(D) * lane(C_pad) * 4           # fc weight
           + 2 * 8 * lane(C_pad) * 4                # bias
           + B_pad * 128 * 4                        # inv_count
           + 4 * sub(TK) * 128 * 4)                 # token / bag id tiles
    if use_fast:
        est += 2 * sub(V_pad) * lane(D) * emb_bytes  # resident table
    else:
        est += 2 * sub(TK) * lane(D) * emb_bytes     # gathered-row double buffer
    vmem_limit = int(min(max(2 * est + (4 << 20), 16 << 20), 32 << 20))

    compiler_params = pltpu.CompilerParams(
        dimension_semantics=("arbitrary",),          # token-tile axis is a reduction
        vmem_limit_bytes=vmem_limit,
    )
    out_shape = jax.ShapeDtypeStruct((B_pad, C_pad), jnp.float32)

    if use_fast:
        emb_p = jnp.pad(emb_table, ((0, V_pad - V), (0, 0)))
        grid_spec = pltpu.PrefetchScalarGridSpec(
            num_scalar_prefetch=0,
            grid=(num_tiles,),
            in_specs=[
                pl.BlockSpec((1, TK, 1), lambda t: (t, 0, 0)),    # token ids (column)
                pl.BlockSpec((1, 1, TK), lambda t: (t, 0, 0)),    # bag ids (row)
                pl.BlockSpec((B_pad, 1), lambda t: (0, 0)),       # 1/count
                pl.BlockSpec((V_pad, D), lambda t: (0, 0)),       # VMEM-resident table
                pl.BlockSpec((D, C_pad), lambda t: (0, 0)),       # fc weight^T
                pl.BlockSpec((1, C_pad), lambda t: (0, 0)),       # fc bias
            ],
            out_specs=pl.BlockSpec((B_pad, C_pad), lambda t: (0, 0)),
            scratch_shapes=[pltpu.VMEM((B_pad, D), jnp.float32)],
        )
        out_full = pl.pallas_call(
            _fast_vmem_kernel, out_shape=out_shape, grid_spec=grid_spec,
            compiler_params=compiler_params,
        )(tok_col_3d, bag_3d, inv_count, emb_p, w_t, bias2d)
    else:
        grid_spec = pltpu.PrefetchScalarGridSpec(
            num_scalar_prefetch=1,                                # token ids -> SMEM
            grid=(num_tiles,),
            in_specs=[
                pl.BlockSpec((1, 1, TK), lambda t, txt: (t, 0, 0)),   # bag ids
                pl.BlockSpec((B_pad, 1), lambda t, txt: (0, 0)),      # 1/count
                pl.BlockSpec(memory_space=pl.ANY),                    # table stays in HBM
                pl.BlockSpec((D, C_pad), lambda t, txt: (0, 0)),      # fc weight^T
                pl.BlockSpec((1, C_pad), lambda t, txt: (0, 0)),      # fc bias
            ],
            out_specs=pl.BlockSpec((B_pad, C_pad), lambda t, txt: (0, 0)),
            scratch_shapes=[
                pltpu.VMEM((2, TK, D), emb_table.dtype),   # double-buffered gathered rows
                pltpu.SemaphoreType.DMA((2,)),             # ONE semaphore per slot
                pltpu.VMEM((B_pad, D), jnp.float32),       # per-bag sum accumulator
            ],
        )
        out_full = pl.pallas_call(
            _hbm_gather_kernel, out_shape=out_shape, grid_spec=grid_spec,
            compiler_params=compiler_params,
        )(text_p, bag_3d, inv_count, emb_table, w_t, bias2d)

    return out_full[:B, :C]


# ---------------------------------------------------------------------------
# Pure-JAX reference (torch EmbeddingBag(mean) + Linear semantics)
# ---------------------------------------------------------------------------
def _reference_forward(text, offsets, emb_table, fc_w, fc_b):
    L = int(text.shape[0])
    B = int(offsets.shape[0])
    offsets_ext = jnp.concatenate(
        [offsets.astype(jnp.int32), jnp.array([L], jnp.int32)])
    rows = emb_table[text]                                    # (L, D)
    pooled = []
    for b in range(B):
        s, e = int(offsets_ext[b]), int(offsets_ext[b + 1])
        if e > s:
            pooled.append(rows[s:e].mean(axis=0))
        else:
            pooled.append(jnp.zeros((emb_table.shape[1],), jnp.float32))
    pooled = jnp.stack(pooled)                                # (B, D)
    return jnp.dot(pooled, fc_w.T, precision="highest") + fc_b


if __name__ == "__main__":
    key = jax.random.PRNGKey(0)
    k_emb, k_fc, k_txt, k_emb2, k_fc2, k_txt2 = jax.random.split(key, 6)

    num_class = 4

    # ---- Test 1: small vocab -> VMEM-resident fast path ----------------------
    vocab, dim = 256, 128
    emb = jax.random.uniform(k_emb, (vocab, dim), jnp.float32, -0.5, 0.5)
    fc_w = jax.random.uniform(k_fc, (num_class, dim), jnp.float32, -0.5, 0.5)
    fc_b = jnp.zeros((num_class,), jnp.float32)               # init_weights(): zero bias
    text = jax.random.randint(k_txt, (8,), 0, vocab, dtype=jnp.int32)
    offsets = jnp.array([0, 3], dtype=jnp.int32)               # bag0: [0,3), bag1: [3,8)

    out = text_classification_forward(text, offsets, emb, fc_w, fc_b)
    jax.block_until_ready(out)
    ref = _reference_forward(text, offsets, emb, fc_w, fc_b)
    assert out.shape == (2, num_class)
    assert jnp.allclose(out, ref, atol=1e-4, rtol=1e-4), float(jnp.max(jnp.abs(out - ref)))

    # ---- Test 2: large vocab forced onto the HBM double-buffered gather path --
    vocab2, dim2 = 4096, 128
    emb2 = jax.random.uniform(k_emb2, (vocab2, dim2), jnp.float32, -0.5, 0.5)
    fc_w2 = jax.random.uniform(k_fc2, (num_class, dim2), jnp.float32, -0.5, 0.5)
    fc_b2 = jnp.zeros((num_class,), jnp.float32)
    text2 = jax.random.randint(k_txt2, (600,), 0, vocab2, dtype=jnp.int32)
    offsets2 = jnp.array([0, 100, 101, 350], dtype=jnp.int32)   # 4 bags, multi-tile tokens

    out2 = text_classification_forward(text2, offsets2, emb2, fc_w2, fc_b2,
                                        force_hbm_gather=True)
    jax.block_until_ready(out2)
    ref2 = _reference_forward(text2, offsets2, emb2, fc_w2, fc_b2)
    assert out2.shape == (4, num_class)
    assert jnp.allclose(out2, ref2, atol=2e-3, rtol=2e-3), float(jnp.max(jnp.abs(out2 - ref2)))

    print("KERNEL_OK")
</pallas_src>

<mosaic_0001>
module attributes {stable_mosaic.version = 11 : i64} {
  func.func @_fast_vmem_kernel(%arg0: i32, %arg1: memref<1x8x1xi32, #tpu.memory_space<vmem>>, %arg2: memref<1x1x8xi32, #tpu.memory_space<vmem>>, %arg3: memref<8x1xf32, #tpu.memory_space<vmem>>, %arg4: memref<256x128xf32, #tpu.memory_space<vmem>>, %arg5: memref<128x128xf32, #tpu.memory_space<vmem>>, %arg6: memref<1x128xf32, #tpu.memory_space<vmem>>, %arg7: memref<8x128xf32, #tpu.memory_space<vmem>>, %arg8: memref<8x128xf32, #tpu.memory_space<vmem>>) attributes {dimension_semantics = [#tpu.dimension_semantics<arbitrary>], iteration_bounds = array<i64: 1>, scalar_prefetch = 0 : i64, scratch_operands = 1 : i64, tpu.core_type = #tpu.core_type<tc>, window_params = [{transform_indices = @transform_0, window_bounds = array<i64: 1, 8, 1>}, {transform_indices = @transform_1, window_bounds = array<i64: 1, 1, 8>}, {pipeline_mode = #tpu.pipeline_mode<synchronous>, transform_indices = @transform_2, window_bounds = array<i64: 8, 1>}, {pipeline_mode = #tpu.pipeline_mode<synchronous>, transform_indices = @transform_3, window_bounds = array<i64: 256, 128>}, {pipeline_mode = #tpu.pipeline_mode<synchronous>, transform_indices = @transform_4, window_bounds = array<i64: 128, 128>}, {pipeline_mode = #tpu.pipeline_mode<synchronous>, transform_indices = @transform_5, window_bounds = array<i64: 1, 128>}, {pipeline_mode = #tpu.pipeline_mode<synchronous>, transform_indices = @transform_6, window_bounds = array<i64: 8, 128>}]} {
    %c0_i32 = arith.constant 0 : i32
    %0 = arith.cmpi eq, %arg0, %c0_i32 : i32
    %1 = arith.extui %0 : i1 to i32
    %c0_i32_0 = arith.constant 0 : i32
    %2 = arith.cmpi ne, %1, %c0_i32_0 : i32
    scf.if %2 {
      %cst_15 = arith.constant 0.000000e+00 : f32
      %26 = vector.broadcast %cst_15 : f32 to vector<8x128xf32>
      %c0_16 = arith.constant 0 : index
      %c0_17 = arith.constant 0 : index
      %27 = vector.load %arg8[%c0_16, %c0_17] : memref<8x128xf32, #tpu.memory_space<vmem>>, vector<8x128xf32>
      tpu.vector_store %arg8[%c0_16, %c0_17], %26 {strides = array<i32>} : memref<8x128xf32, #tpu.memory_space<vmem>>, vector<8x128xf32>,
    } else {
    }
    %c0 = arith.constant 0 : index
    %c0_1 = arith.constant 0 : index
    %c0_2 = arith.constant 0 : index
    %3 = vector.load %arg1[%c0, %c0_1, %c0_2] : memref<1x8x1xi32, #tpu.memory_space<vmem>>, vector<1x8x1xi32>
    %4 = vector.shape_cast %3 : vector<1x8x1xi32> to vector<8x1xi32>
    %c0_3 = arith.constant 0 : index
    %c0_4 = arith.constant 0 : index
    %c0_5 = arith.constant 0 : index
    %5 = vector.load %arg2[%c0_3, %c0_4, %c0_5] : memref<1x1x8xi32, #tpu.memory_space<vmem>>, vector<1x1x8xi32>
    %6 = vector.shape_cast %5 : vector<1x1x8xi32> to vector<1x8xi32>
    %c0_6 = arith.constant 0 : index
    %c0_7 = arith.constant 0 : index
    %7 = vector.load %arg4[%c0_6, %c0_7] : memref<256x128xf32, #tpu.memory_space<vmem>>, vector<256x128xf32>
    %8 = tpu.iota {dimensions = array<i32: 1>} : vector<8x256xi32>
    %9 = vector.broadcast %4 : vector<8x1xi32> to vector<8x256xi32>
    %10 = arith.cmpi eq, %8, %9 : vector<8x256xi32>
    %11 = arith.extui %10 : vector<8x256xi1> to vector<8x256xi32>
    %12 = arith.sitofp %11 : vector<8x256xi32> to vector<8x256xf32>
    %13 = tpu.iota {dimensions = array<i32: 0>} : vector<8x8xi32>
    %14 = vector.broadcast %6 : vector<1x8xi32> to vector<8x8xi32>
    %15 = arith.cmpi eq, %13, %14 : vector<8x8xi32>
    %16 = arith.extui %15 : vector<8x8xi1> to vector<8x8xi32>
    %17 = arith.sitofp %16 : vector<8x8xi32> to vector<8x8xf32>
    %cst = arith.constant dense<0.000000e+00> : vector<8x256xf32>
    %18 = tpu.matmul %17, %12, %cst {dimension_numbers = #tpu.dot_dimension_numbers<[1], [0], [0], [1], [0, 0, 1, 1], [], []>} : vector<8x8xf32>, vector<8x256xf32>, vector<8x256xf32> -> vector<8x256xf32>
    %c0_8 = arith.constant 0 : index
    %c0_9 = arith.constant 0 : index
    %19 = vector.load %arg8[%c0_8, %c0_9] : memref<8x128xf32, #tpu.memory_space<vmem>>, vector<8x128xf32>
    %cst_10 = arith.constant dense<0.000000e+00> : vector<8x128xf32>
    %20 = tpu.matmul %18, %7, %cst_10 {dimension_numbers = #tpu.dot_dimension_numbers<[1], [0], [0], [1], [0, 0, 1, 1], [], []>} : vector<8x256xf32>, vector<256x128xf32>, vector<8x128xf32> -> vector<8x128xf32>
    %21 = arith.addf %19, %20 : vector<8x128xf32>
    %c0_11 = arith.constant 0 : index
    %c0_12 = arith.constant 0 : index
    %22 = vector.load %arg8[%c0_11, %c0_12] : memref<8x128xf32, #tpu.memory_space<vmem>>, vector<8x128xf32>
    tpu.vector_store %arg8[%c0_11, %c0_12], %21 {strides = array<i32>} : memref<8x128xf32, #tpu.memory_space<vmem>>, vector<8x128xf32>,
    %c0_i32_13 = arith.constant 0 : i32
    %23 = arith.cmpi eq, %arg0, %c0_i32_13 : i32
    %24 = arith.extui %23 : i1 to i32
    %c0_i32_14 = arith.constant 0 : i32
    %25 = arith.cmpi ne, %24, %c0_i32_14 : i32
    scf.if %25 {
      %c0_15 = arith.constant 0 : index
      %c0_16 = arith.constant 0 : index
      %26 = vector.load %arg8[%c0_15, %c0_16] : memref<8x128xf32, #tpu.memory_space<vmem>>, vector<8x128xf32>
      %c0_17 = arith.constant 0 : index
      %c0_18 = arith.constant 0 : index
      %27 = vector.load %arg3[%c0_17, %c0_18] : memref<8x1xf32, #tpu.memory_space<vmem>>, vector<8x1xf32>
      %28 = vector.broadcast %27 : vector<8x1xf32> to vector<8x128xf32>
      %29 = arith.mulf %26, %28 : vector<8x128xf32>
      %c0_19 = arith.constant 0 : index
      %c0_20 = arith.constant 0 : index
      %30 = vector.load %arg5[%c0_19, %c0_20] : memref<128x128xf32, #tpu.memory_space<vmem>>, vector<128x128xf32>
      %cst_21 = arith.constant dense<0.000000e+00> : vector<8x128xf32>
      %31 = tpu.matmul %29, %30, %cst_21 {dimension_numbers = #tpu.dot_dimension_numbers<[1], [0], [0], [1], [0, 0, 1, 1], [], []>} : vector<8x128xf32>, vector<128x128xf32>, vector<8x128xf32> -> vector<8x128xf32>
      %c0_22 = arith.constant 0 : index
      %c0_23 = arith.constant 0 : index
      %32 = vector.load %arg6[%c0_22, %c0_23] : memref<1x128xf32, #tpu.memory_space<vmem>>, vector<1x128xf32>
      %33 = vector.broadcast %32 : vector<1x128xf32> to vector<8x128xf32>
      %34 = arith.addf %31, %33 : vector<8x128xf32>
      %c0_24 = arith.constant 0 : index
      %c0_25 = arith.constant 0 : index
      %35 = vector.load %arg7[%c0_24, %c0_25] : memref<8x128xf32, #tpu.memory_space<vmem>>, vector<8x128xf32>
      tpu.vector_store %arg7[%c0_24, %c0_25], %34 {strides = array<i32>} : memref<8x128xf32, #tpu.memory_space<vmem>>, vector<8x128xf32>,
    } else {
    }
    return
  }
  func.func @transform_0(%arg0: i32) -> (i32, i32, i32) {
    %c0_i32 = arith.constant 0 : i32
    %c0_i32_0 = arith.constant 0 : i32
    %c0_i32_1 = arith.constant 0 : i32
    return %arg0, %c0_i32, %c0_i32_0 : i32, i32, i32
  }
  func.func @transform_1(%arg0: i32) -> (i32, i32, i32) {
    %c0_i32 = arith.constant 0 : i32
    %c0_i32_0 = arith.constant 0 : i32
    %c0_i32_1 = arith.constant 0 : i32
    return %arg0, %c0_i32, %c0_i32_0 : i32, i32, i32
  }
  func.func @transform_2(%arg0: i32) -> (i32, i32) {
    %c0_i32 = arith.constant 0 : i32
    %c0_i32_0 = arith.constant 0 : i32
    %c0_i32_1 = arith.constant 0 : i32
    return %c0_i32, %c0_i32_0 : i32, i32
  }
  func.func @transform_3(%arg0: i32) -> (i32, i32) {
    %c0_i32 = arith.constant 0 : i32
    %c0_i32_0 = arith.constant 0 : i32
    %c0_i32_1 = arith.constant 0 : i32
    return %c0_i32, %c0_i32_0 : i32, i32
  }
  func.func @transform_4(%arg0: i32) -> (i32, i32) {
    %c0_i32 = arith.constant 0 : i32
    %c0_i32_0 = arith.constant 0 : i32
    %c0_i32_1 = arith.constant 0 : i32
    return %c0_i32, %c0_i32_0 : i32, i32
  }
  func.func @transform_5(%arg0: i32) -> (i32, i32) {
    %c0_i32 = arith.constant 0 : i32
    %c0_i32_0 = arith.constant 0 : i32
    %c0_i32_1 = arith.constant 0 : i32
    return %c0_i32, %c0_i32_0 : i32, i32
  }
  func.func @transform_6(%arg0: i32) -> (i32, i32) {
    %c0_i32 = arith.constant 0 : i32
    %c0_i32_0 = arith.constant 0 : i32
    %c0_i32_1 = arith.constant 0 : i32
    return %c0_i32, %c0_i32_0 : i32, i32
  }
}

</mosaic_0001>

<bundles_post_ra>
// kernel: tpu_custom_call.1
= control target key start
LH: loop header
LB: loop body
LE: loop exit
PB: predicated region body
PF: predicated region fallthrough
CT: control target
= control target key end

     0   :  { %11 = vsyncpa [#allocation4], 0  ;;  %s432_s0 = inlined_call_operand.vmem [shape: s32[1,8,1], index: 0, kind: input, shape index: {}]   ;;  %s433_s1 = inlined_call_operand.vmem [shape: s32[1,1,8], index: 1, kind: input, shape index: {}]   ;;  %s434_s2 = inlined_call_operand.vmem [shape: f32[8,1], index: 2, kind: input, shape index: {}]   ;;  %s435_s3 = inlined_call_operand.hbm [shape: f32[256,128], index: 3, kind: input, shape index: {}]   ;;  %s436_s4 = inlined_call_operand.hbm [shape: f32[128,128], index: 4, kind: input, shape index: {}]   ;;  %s437_s5 = inlined_call_operand.vmem [shape: f32[1,128], index: 5, kind: input, shape index: {}]   ;;  %s438_s6 = inlined_call_operand.hbm [shape: f32[8,128], index: 6, kind: output, shape index: {}]  }
   0x1   :  { %12 = vsyncpa [#allocation7], 0 }
   0x2   :  { %13 = vsyncpa [#allocation5], 0  ;;  %s24_s23 = sshll.u32 %s435_s3, 4  ;;  %s366_s24 = smov [#allocation3]   ;;  %s25_s23 = int_to_ptr.hbm [resolvable:$true] %s24_s23 }
   0x3   :  { %s26_s25 = sshll.u32 %s366_s24, 4  ;;  %s37_s28 = sshll.u32 %s436_s4, 4  ;;  %s27_s25 = int_to_ptr.vmem [resolvable:$true] %s26_s25  ;;  %s38_s28 = int_to_ptr.hbm [resolvable:$true] %s37_s28 }
   0x4   :  { %s367_s29 = smov 128   ;;  %s368_s30 = smov 8  }
   0x5   :  { %32 = dma.hbm_to_vmem [thread:$0]  %s25_s23, 4096, %s27_s25, [#allocation4], %s367_s29, %s367_s29, %s368_s30  }
   0x6   :  { %s369_s7 = smov [#allocation6]  }
   0x7   :  { %s39_s8 = sshll.u32 %s369_s7, 4  ;;  %s40_s8 = int_to_ptr.vmem [resolvable:$true] %s39_s8 }
   0x8   :  { %45 = dma.hbm_to_vmem [thread:$0]  %s38_s28, 2048, %s40_s8, [#allocation7], %s367_s29, %s367_s29, %s368_s30  }
   0x9   :  { %360 = dma.done.wait [#allocation4], 4096  }
   0xa   :  { %361 = vsyncadd [#allocation4], 4294963200 }
   0xb   :  { %362 = dma.done.wait [#allocation7], 2048  }
   0xc   :  { %363 = vsyncadd [#allocation7], 4294965248  ;;  %v370_v0 = vmov 0   ;;  %v61_v1 = vld [vmem:[%s432_s0] sm:$0xff]  ;;  %v78_v3 = vld [vmem:[#allocation3 + $0x78] sm:$0xff]  ;;  %v95_v15 = vlaneseq  ;;  %v371_v32 = vmov 0.0  }
   0xd   :  { %285 = vset.pattern.permute.xlu0 %v370_v0  ;;  %v204_v2 = vld [vmem:[%s434_s2] sm:$0xff]  ;;  %v77_v4 = vld [vmem:[#allocation3 + $0x70] sm:$0xff]  ;;  %158 = vmatpush.msra.mxu2 %v78_v3  ;;  %v94_v5 = vld [vmem:[#allocation3 + $0xf8] sm:$0xff]  ;;  %vm113_vm1 = vcmask 64512   ;;  %v372_v35 = vmov 1.0   ;;  %s373_s12 = smov [#allocation8]  }
   0xe   :  { %99 = vperm.xlu0 %285, %v61_v1   ;;  %v76_v6 = vld [vmem:[#allocation3 + $0x68] sm:$0xff]  ;;  %178 = vmatpush.msra.mxu3 %v94_v5  ;;  %v93_v7 = vld [vmem:[#allocation3 + $0xf0] sm:$0xff]  ;;  %v75_v9 = vld [vmem:[#allocation3 + $0x60] sm:$0xff]  ;;  %v96_v20 = vand.u32 127, %v95_v15  ;;  %v108_v21 = vshrl.u32 %v95_v15, 7  ;;  %s257_s13 = sshll.u32 %s373_s12, 4  ;;  %s258_s13 = int_to_ptr.vmem [resolvable:$true] %s257_s13 }
   0xf   :  { %159 = vmatpush.msra.mxu2 %v77_v4  ;;  %v92_v8 = vld [vmem:[#allocation3 + $0xe8] sm:$0xff]  ;;  %v91_v10 = vld [vmem:[#allocation3 + $0xe0] sm:$0xff]  ;;  %v74_v11 = vld [vmem:[#allocation3 + $0x58] sm:$0xff]  ;;  %s259_s16 = sshll.u32 %s438_s6, 4  ;;  %s260_s16 = int_to_ptr.hbm [resolvable:$true] %s259_s16 }
  0x10   :  { %179 = vmatpush.msra.mxu3 %v93_v7  ;;  %v90_v12 = vld [vmem:[#allocation3 + $0xd8] sm:$0xff]  ;;  %v73_v13 = vld [vmem:[#allocation3 + $0x50] sm:$0xff]  ;;  %v72_v16 = vld [vmem:[#allocation3 + $0x48] sm:$0xff]  ;;  %v97_v27 = vadd.s32 128, %v96_v20 }
  0x11   :  { %160 = vmatpush.msra.mxu2 %v76_v6  ;;  %v89_v14 = vld [vmem:[#allocation3 + $0xd0] sm:$0xff]  ;;  %v88_v17 = vld [vmem:[#allocation3 + $0xc8] sm:$0xff]  ;;  %v71_v18 = vld [vmem:[#allocation3 + $0x40] sm:$0xff] }
  0x12   :  { %180 = vmatpush.msra.mxu3 %v92_v8  ;;  %v87_v19 = vld [vmem:[#allocation3 + $0xc0] sm:$0xff]  ;;  %v70_v23 = vld [vmem:[#allocation3 + $0x38] sm:$0xff]  ;;  %v69_v25 = vld [vmem:[#allocation3 + $0x30] sm:$0xff] }
  0x13   :  { %161 = vmatpush.msra.mxu2 %v75_v9  ;;  %v286_v22 = vld [vmem:[%s433_s1] ss:$0 sm:$0xff]  ;;  %v86_v24 = vld [vmem:[#allocation3 + $0xb8] sm:$0xff]  ;;  %v85_v26 = vld [vmem:[#allocation3 + $0xb0] sm:$0xff] }
  0x14   :  { %181 = vmatpush.msra.mxu3 %v91_v10  ;;  %vm110_vm0 = vcmp.eq.s32.totalorder %v108_v21, %v286_v22  ;;  %v68_v28 = vld [vmem:[#allocation3 + $0x28] sm:$0xff]  ;;  %v67_v30 = vld [vmem:[#allocation3 + $0x20] sm:$0xff]  ;;  %v66_v34 = vld [vmem:[#allocation3 + $0x18] sm:$0xff] }
  0x15   :  { %162 = vmatpush.msra.mxu2 %v74_v11  ;;  %v84_v29 = vld [vmem:[#allocation3 + $0xa8] sm:$0xff]  ;;  %v272_v33 = vsel %vm110_vm0, 1.0, %v371_v32  ;;  %v65_v36 = vld [vmem:[#allocation3 + $0x10] sm:$0xff]  ;;  %v63_v38 = vld [vmem:[#allocation3] sm:$0xff] }
  0x16   :  { %207 = vperm.xlu0 %285, %v204_v2   ;;  %182 = vmatpush.msra.mxu3 %v90_v12  ;;  %v64_v37 = vld [vmem:[#allocation3 + $0x8] sm:$0xff]  ;;  %v83_v39 = vld [vmem:[#allocation3 + $0xa0] sm:$0xff]  ;;  %v82_v40 = vld [vmem:[#allocation3 + $0x98] sm:$0xff] }
  0x17   :  { %163 = vmatpush.msra.mxu2 %v73_v13  ;;  %v81_v41 = vld [vmem:[#allocation3 + $0x90] sm:$0xff]  ;;  %v80_v42 = vld [vmem:[#allocation3 + $0x88] sm:$0xff]  ;;  %v79_v43 = vld [vmem:[#allocation3 + $0x80] sm:$0xff] }
  0x18   :  { %183 = vmatpush.msra.mxu3 %v89_v14  ;;  %v226_v44 = vld [vmem:[#allocation6 + $0x78] sm:$0xff]  ;;  %v225_v45 = vld [vmem:[#allocation6 + $0x70] sm:$0xff]  ;;  %v224_v46 = vld [vmem:[#allocation6 + $0x68] sm:$0xff] }
  0x19   :  { %164 = vmatpush.msra.mxu2 %v72_v16  ;;  %231 = vmatpush.msra.mxu0 %v226_v44  ;;  %v223_v47 = vld [vmem:[#allocation6 + $0x60] sm:$0xff]  ;;  %v222_v48 = vld [vmem:[#allocation6 + $0x58] sm:$0xff]  ;;  %v221_v49 = vld [vmem:[#allocation6 + $0x50] sm:$0xff] }
  0x1a   :  { %184 = vmatpush.msra.mxu3 %v88_v17  ;;  %v220_v50 = vld [vmem:[#allocation6 + $0x48] sm:$0xff]  ;;  %v219_v51 = vld [vmem:[#allocation6 + $0x40] sm:$0xff]  ;;  %v218_v52 = vld [vmem:[#allocation6 + $0x38] sm:$0xff] }
  0x1b   :  { %165 = vmatpush.msra.mxu2 %v71_v18  ;;  %232 = vmatpush.msra.mxu0 %v225_v45  ;;  %v217_v55 = vld [vmem:[#allocation6 + $0x30] sm:$0xff]  ;;  %v216_v56 = vld [vmem:[#allocation6 + $0x28] sm:$0xff]  ;;  %v215_v57 = vld [vmem:[#allocation6 + $0x20] sm:$0xff] }
  0x1c   :  { %185 = vmatpush.msra.mxu3 %v87_v19  ;;  %v214_v58 = vld [vmem:[#allocation6 + $0x18] sm:$0xff]  ;;  %v213_v59 = vld [vmem:[#allocation6 + $0x10] sm:$0xff]  ;;  %v212_v60 = vld [vmem:[#allocation6 + $0x8] sm:$0xff] }
  0x1d   :  { %166 = vmatpush.msra.mxu2 %v70_v23  ;;  %233 = vmatpush.msra.mxu0 %v224_v46  ;;  %v211_v61 = vld [vmem:[#allocation6] sm:$0xff] }
  0x1e   :  { %186 = vmatpush.msra.mxu3 %v86_v24  ;;  %v287_v3 = vld [vmem:[%s437_s5] ss:$0 sm:$0xff] }
  0x1f   :  { %167 = vmatpush.msra.mxu2 %v69_v25  ;;  %234 = vmatpush.msra.mxu0 %v223_v47 }
  0x20   :  { %187 = vmatpush.msra.mxu3 %v85_v26 }
  0x21   :  { %168 = vmatpush.msra.mxu2 %v68_v28  ;;  %235 = vmatpush.msra.mxu0 %v222_v48 }
  0x22   :  { %188 = vmatpush.msra.mxu3 %v84_v29 }
  0x23   :  { %169 = vmatpush.msra.mxu2 %v67_v30  ;;  %236 = vmatpush.msra.mxu0 %v221_v49 }
  0x24   :  { %189 = vmatpush.msra.mxu3 %v83_v39 }
  0x25   :  { %170 = vmatpush.msra.mxu2 %v66_v34  ;;  %237 = vmatpush.msra.mxu0 %v220_v50 }
  0x26   :  { %190 = vmatpush.msra.mxu3 %v82_v40 }
  0x27   :  { %171 = vmatpush.msra.mxu2 %v65_v36  ;;  %238 = vmatpush.msra.mxu0 %v219_v51 }
  0x28   :  { %191 = vmatpush.msra.mxu3 %v81_v41 }
  0x29   :  { %172 = vmatpush.msra.mxu2 %v64_v37  ;;  %239 = vmatpush.msra.mxu0 %v218_v52 }
  0x2a   :  { %192 = vmatpush.msra.mxu3 %v80_v42 }
  0x2b   :  { %173 = vmatpush.msra.mxu2 %v63_v38  ;;  %240 = vmatpush.msra.mxu0 %v217_v55 }
  0x2c   :  { %193 = vmatpush.msra.mxu3 %v79_v43 }
  0x2d   :  { %241 = vmatpush.msra.mxu0 %v216_v56 }
  0x2f   :  { %242 = vmatpush.msra.mxu0 %v215_v57 }
  0x31   :  { %243 = vmatpush.msra.mxu0 %v214_v58 }
  0x33   :  { %244 = vmatpush.msra.mxu0 %v213_v59 }
  0x35   :  { %245 = vmatpush.msra.mxu0 %v212_v60 }
  0x37   :  { %246 = vmatpush.msra.mxu0 %v211_v61 }
  0x80   :  { %v100_v31 = vpop.permute.xlu0 %99 }
  0x81   :  { %vm101_vm2 = vcmp.eq.s32.totalorder %v96_v20, %v100_v31  ;;  %vm102_vm3 = vcmp.eq.s32.totalorder %v97_v27, %v100_v31 }
  0x82   :  { %273 = vmatpush.msk.msra.mxu1 %vm101_vm2, %v372_v35 }
  0x83   :  { %274 = vmatmul.msk.f32.vlgmr.msra.gmra.mxu1 %vm113_vm1, %v272_v33 }
  0x84   :  { %275 = vmatpush.msk.msrb.mxu1 %vm102_vm3, %v372_v35 }
  0x88   :  { %v208_v1 = vpop.permute.xlu0 %207 }
  0x8b   :  { %276 = vmatmul.msk.f32.vlgmr.msrb.gmra.mxu1 %vm113_vm1, %v272_v33 }
 0x100   :  { %v134_v53 = vpop.f32.mrf.mxu1 }
 0x101   :  { %174 = vmatmul.f32.vlgmr.msra.gmra.mxu2 %v134_v53 }
 0x108   :  { %v154_v54 = vpop.f32.mrf.mxu1 }
 0x109   :  { %194 = vmatmul.f32.vlgmr.msra.gmra.mxu3 %v154_v54 }
 0x184   :  { %v175_v62 = vpop.f32.mrf.mxu2 }
 0x18c   :  { %v195_v63 = vpop.f32.mrf.mxu3 }
 0x18d   :  { %v196_v0 = vadd.f32 %v195_v63, %v175_v62 }
 0x18f   :  { %v210_v2 = vmul.f32 %v208_v1, %v196_v0 }
 0x191   :  { %247 = vmatmul.f32.vlgmr.msra.gmra.mxu0 %v210_v2 }
 0x20e   :  { %v248_v4 = vpop.f32.mrf.mxu0 }
 0x20f   :  { %v249_v5 = vadd.f32 %v287_v3, %v248_v4 }
 0x211   :  { %251 = vst [vmem:[#allocation8] sm:$0xff] %v249_v5 }
 0x212   :  { %262 = dma.vmem_to_hbm [thread:$0]  %s258_s13, 128, %s260_s16, [#allocation5]  }
 0x213   :  { %364 = dma.done.wait [#allocation5], 128  }
 0x214   :  { %365 = vsyncadd [#allocation5], 4294967168 }
 0x215   :  { %267 = vsyncpa [#allocation4], 1 }
 0x216   :  { %268 = vsyncpa [#allocation7], 1 }
 0x217   :  { %269 = vsyncpa [#allocation5], 1 }

</bundles_post_ra>
